<compile_context>
chip_gen: v7x
topology: tpu7x:2x2x1
jax: 0.10.0
libtpu: 0.0.40
codegen_flags: <defaults>
</compile_context>

<pallas_src>
import functools

import jax
import jax.numpy as jnp
import numpy as np
from jax import lax
from jax.experimental import pallas as pl
from jax.experimental.pallas import tpu as pltpu


# ----------------------------------------------------------------------------
# Kernel 1: row-tiled linear  o = x @ w + b
# ----------------------------------------------------------------------------
def _linear_kernel(x_ref, w_ref, b_ref, o_ref):
    o_ref[...] = (
        jnp.dot(x_ref[...], w_ref[...], preferred_element_type=jnp.float32)
        + b_ref[...]
    )


def pallas_linear(x, w, b, *, tile_m=512):
    """x: (M, K), w: (K, N), b: (1, N) -> (M, N), tiled over rows."""
    M, K = x.shape
    N = w.shape[1]
    tm = M if M <= tile_m else tile_m
    cost = pl.CostEstimate(
        flops=2 * M * K * N,
        transcendentals=0,
        bytes_accessed=4 * (M * K + K * N + M * N + N),
    )
    return pl.pallas_call(
        _linear_kernel,
        out_shape=jax.ShapeDtypeStruct((M, N), jnp.float32),
        grid=(pl.cdiv(M, tm),),
        in_specs=[
            pl.BlockSpec((tm, K), lambda i: (i, 0)),
            pl.BlockSpec((K, N), lambda i: (0, 0)),
            pl.BlockSpec((1, N), lambda i: (0, 0)),
        ],
        out_specs=pl.BlockSpec((tm, N), lambda i: (i, 0)),
        compiler_params=pltpu.CompilerParams(dimension_semantics=("parallel",)),
        cost_estimate=cost,
    )(x, w, b)


# ----------------------------------------------------------------------------
# Kernel 2: fused bidirectional LSTM recurrence
#   grid = (direction, time_chunk); backward reversal handled by index_maps.
# ----------------------------------------------------------------------------
def _bilstm_kernel(xp_ref, whh_ref, out_ref, h_sc, c_sc, *, hidden_dim, chunk):
    # xp_ref : (Tc, B, 4H)  pre-projected gates for this direction/time chunk
    # whh_ref: (H, 4H)      recurrent weights (transposed) for this direction
    # out_ref: (Tc, B, H)   hidden outputs for this direction/time chunk
    # h_sc/c_sc: (B, H)     recurrent state, persists across time chunks
    d = pl.program_id(0)      # 0 = forward, 1 = backward
    cblk = pl.program_id(1)   # time-chunk index (sequential / "arbitrary")
    H = hidden_dim
    Tc = chunk

    @pl.when(cblk == 0)
    def _():
        h_sc[...] = jnp.zeros_like(h_sc)
        c_sc[...] = jnp.zeros_like(c_sc)

    def step(s, carry):
        # forward walks local 0..Tc-1; backward walks Tc-1..0 within the chunk
        local = s + d * (Tc - 1 - 2 * s)
        gates = xp_ref[local] + jnp.dot(
            h_sc[...], whh_ref[...], preferred_element_type=jnp.float32
        )
        # PyTorch LSTM gate order: i, f, g, o
        i = jax.nn.sigmoid(gates[:, 0 * H : 1 * H])
        f = jax.nn.sigmoid(gates[:, 1 * H : 2 * H])
        g = jnp.tanh(gates[:, 2 * H : 3 * H])
        o = jax.nn.sigmoid(gates[:, 3 * H : 4 * H])
        c_new = f * c_sc[...] + i * g
        h_new = o * jnp.tanh(c_new)
        c_sc[...] = c_new
        h_sc[...] = h_new
        out_ref[local] = h_new
        return carry

    lax.fori_loop(0, Tc, step, 0, unroll=True)


def _largest_divisor_leq(n, cap):
    for t in range(min(n, cap), 0, -1):
        if n % t == 0:
            return t
    return 1


def pallas_bilstm(xp_all, whh_stack, *, hidden_dim):
    """xp_all: (T, B, 8H) [fwd gates | bwd gates] per step,
    whh_stack: (2, H, 4H) -> (2, T, B, H) stacked fwd/bwd hidden sequences."""
    T, B, _ = xp_all.shape
    H = hidden_dim
    Tc = _largest_divisor_leq(T, 32)   # chunk of timesteps per grid step
    nc = T // Tc

    kernel = functools.partial(_bilstm_kernel, hidden_dim=H, chunk=Tc)

    def xp_map(d, c):
        # forward reads time-chunk c, lane-half 0; backward reads chunk nc-1-c,
        # lane-half 1 (time reversal lives entirely in the index_map).
        return (c + d * (nc - 1 - 2 * c), 0, d)

    def w_map(d, c):
        return (d, 0, 0)

    def out_map(d, c):
        return (d, c + d * (nc - 1 - 2 * c), 0, 0)

    return pl.pallas_call(
        kernel,
        out_shape=jax.ShapeDtypeStruct((2, T, B, H), jnp.float32),
        grid=(2, nc),
        in_specs=[
            pl.BlockSpec((Tc, B, 4 * H), xp_map),
            pl.BlockSpec((None, H, 4 * H), w_map),
        ],
        out_specs=pl.BlockSpec((None, Tc, B, H), out_map),
        scratch_shapes=[
            pltpu.VMEM((B, H), jnp.float32),  # h state
            pltpu.VMEM((B, H), jnp.float32),  # c state
        ],
        compiler_params=pltpu.CompilerParams(
            # direction axis parallel (v7x: one TC per direction),
            # time axis strictly sequential.
            dimension_semantics=("parallel", "arbitrary"),
        ),
    )(xp_all, whh_stack)


# ----------------------------------------------------------------------------
# Kernel 3: fused fc∘fc1 consuming the stacked LSTM output (no HBM concat)
#   o = h[0] @ wf + h[1] @ wb + b      (output padded lane-dense to N=128k)
# ----------------------------------------------------------------------------
def _dual_linear_kernel(h_ref, wf_ref, wb_ref, b_ref, o_ref):
    of = jnp.dot(h_ref[0], wf_ref[...], preferred_element_type=jnp.float32)
    ob = jnp.dot(h_ref[1], wb_ref[...], preferred_element_type=jnp.float32)
    o_ref[...] = of + ob + b_ref[...]


def pallas_dual_linear(h_stack, wf, wb, b, *, tile_m=512):
    """h_stack: (2, M, H), wf/wb: (H, N), b: (1, N) -> (M, N)."""
    _, M, H = h_stack.shape
    N = wf.shape[1]
    tm = M if M <= tile_m else tile_m
    cost = pl.CostEstimate(
        flops=4 * M * H * N,
        transcendentals=0,
        bytes_accessed=4 * (2 * M * H + 2 * H * N + M * N + N),
    )
    return pl.pallas_call(
        _dual_linear_kernel,
        out_shape=jax.ShapeDtypeStruct((M, N), jnp.float32),
        grid=(pl.cdiv(M, tm),),
        in_specs=[
            pl.BlockSpec((2, tm, H), lambda i: (0, i, 0)),
            pl.BlockSpec((H, N), lambda i: (0, 0)),
            pl.BlockSpec((H, N), lambda i: (0, 0)),
            pl.BlockSpec((1, N), lambda i: (0, 0)),
        ],
        out_specs=pl.BlockSpec((tm, N), lambda i: (i, 0)),
        compiler_params=pltpu.CompilerParams(dimension_semantics=("parallel",)),
        cost_estimate=cost,
    )(h_stack, wf, wb, b)


# ----------------------------------------------------------------------------
# Model: parameter init + forward
# ----------------------------------------------------------------------------
def xavier_normal(key, shape):
    fan_out, fan_in = shape  # PyTorch Linear/LSTM weight layout: (out, in)
    std = np.sqrt(2.0 / (fan_in + fan_out))
    return std * jax.random.normal(key, shape, dtype=jnp.float32)


def init_params(key, input_dim, hidden_dim, output_dim):
    ks = jax.random.split(key, 12)
    H = hidden_dim
    p = {}
    # fc_before1: Linear(input_dim, 64)
    p["w_before1"] = xavier_normal(ks[0], (64, input_dim))
    p["b_before1"] = 0.01 * jax.random.normal(ks[1], (64,), dtype=jnp.float32)
    # LSTM forward direction
    p["w_ih_f"] = xavier_normal(ks[2], (4 * H, 64))
    p["w_hh_f"] = xavier_normal(ks[3], (4 * H, H))
    p["b_ih_f"] = jax.random.uniform(ks[4], (4 * H,), jnp.float32, 0.25, 0.5)
    p["b_hh_f"] = jax.random.uniform(ks[5], (4 * H,), jnp.float32, 0.25, 0.5)
    # LSTM backward direction
    p["w_ih_b"] = xavier_normal(ks[6], (4 * H, 64))
    p["w_hh_b"] = xavier_normal(ks[7], (4 * H, H))
    p["b_ih_b"] = jax.random.uniform(ks[8], (4 * H,), jnp.float32, 0.25, 0.5)
    p["b_hh_b"] = jax.random.uniform(ks[9], (4 * H,), jnp.float32, 0.25, 0.5)
    # fc: Linear(2H, 128) ; bias init constant 0
    p["w_fc"] = xavier_normal(ks[10], (128, 2 * H))
    p["b_fc"] = jnp.zeros((128,), jnp.float32)
    # fc1: Linear(128, output_dim)
    p["w_fc1"] = xavier_normal(ks[11], (output_dim, 128))
    p["b_fc1"] = jnp.zeros((output_dim,), jnp.float32)
    return p


def forward(params, inputs):
    """inputs: (T, B, input_dim) float32 -> (T*B, output_dim) float32."""
    T, B, Din = inputs.shape
    p = params
    H = p["w_hh_f"].shape[1]
    Dout = p["w_fc1"].shape[0]

    # --- fold fc_before1 into both LSTM input projections (one matmul) -----
    w_eff_f = p["w_before1"].T @ p["w_ih_f"].T                       # (Din, 4H)
    w_eff_b = p["w_before1"].T @ p["w_ih_b"].T                       # (Din, 4H)
    w_eff = jnp.concatenate([w_eff_f, w_eff_b], axis=1)              # (Din, 8H)
    b_eff_f = p["b_before1"] @ p["w_ih_f"].T + p["b_ih_f"] + p["b_hh_f"]
    b_eff_b = p["b_before1"] @ p["w_ih_b"].T + p["b_ih_b"] + p["b_hh_b"]
    b_eff = jnp.concatenate([b_eff_f, b_eff_b])[None, :]             # (1, 8H)

    x = inputs.reshape(T * B, Din)
    xp_all = pallas_linear(x, w_eff, b_eff).reshape(T, B, 8 * H)     # (T,B,8H)

    # --- fused bidirectional LSTM recurrence --------------------------------
    whh_stack = jnp.stack([p["w_hh_f"].T, p["w_hh_b"].T], axis=0)    # (2,H,4H)
    h_stack = pallas_bilstm(xp_all, whh_stack, hidden_dim=H)         # (2,T,B,H)

    # --- fold fc and fc1 into one lane-dense (padded) matmul ----------------
    w_out = p["w_fc"].T @ p["w_fc1"].T                               # (2H, Dout)
    b_out = p["b_fc"] @ p["w_fc1"].T + p["b_fc1"]                    # (Dout,)
    n_pad = ((Dout + 127) // 128) * 128
    w_out_p = jnp.zeros((2 * H, n_pad), jnp.float32).at[:, :Dout].set(w_out)
    b_out_p = jnp.zeros((1, n_pad), jnp.float32).at[0, :Dout].set(b_out)

    preds_p = pallas_dual_linear(
        h_stack.reshape(2, T * B, H), w_out_p[:H], w_out_p[H:], b_out_p
    )                                                                # (T*B, n_pad)
    return preds_p[:, :Dout]


# ----------------------------------------------------------------------------
# Pure-JAX reference (unfolded, for correctness check)
# ----------------------------------------------------------------------------
def _lstm_dir_ref(xp, whh_t):
    T, B, G = xp.shape
    H = G // 4

    def step(carry, x):
        h, c = carry
        gates = x + h @ whh_t
        i = jax.nn.sigmoid(gates[:, 0 * H : 1 * H])
        f = jax.nn.sigmoid(gates[:, 1 * H : 2 * H])
        g = jnp.tanh(gates[:, 2 * H : 3 * H])
        o = jax.nn.sigmoid(gates[:, 3 * H : 4 * H])
        c = f * c + i * g
        h = o * jnp.tanh(c)
        return (h, c), h

    init = (jnp.zeros((B, H), jnp.float32), jnp.zeros((B, H), jnp.float32))
    _, hs = lax.scan(step, init, xp)
    return hs


def forward_ref(params, inputs):
    T, B, Din = inputs.shape
    p = params
    H = p["w_hh_f"].shape[1]
    x64 = inputs.reshape(T * B, Din) @ p["w_before1"].T + p["b_before1"]
    xp_f = (x64 @ p["w_ih_f"].T + p["b_ih_f"] + p["b_hh_f"]).reshape(T, B, 4 * H)
    xp_b = (x64 @ p["w_ih_b"].T + p["b_ih_b"] + p["b_hh_b"]).reshape(T, B, 4 * H)
    out_f = _lstm_dir_ref(xp_f, p["w_hh_f"].T)
    out_b = _lstm_dir_ref(xp_b[::-1], p["w_hh_b"].T)[::-1]
    flat = jnp.concatenate([out_f, out_b], axis=-1).reshape(T * B, 2 * H)
    fc = flat @ p["w_fc"].T + p["b_fc"]
    return fc @ p["w_fc1"].T + p["b_fc1"]


# ----------------------------------------------------------------------------
if __name__ == "__main__":
    # Small, module-consistent shapes.
    T, B = 8, 2
    input_dim, hidden_dim, output_dim = 16, 32, 16

    key = jax.random.PRNGKey(0)
    k_param, k_in = jax.random.split(key)
    params = init_params(k_param, input_dim, hidden_dim, output_dim)
    inputs = jax.random.normal(k_in, (T, B, input_dim), dtype=jnp.float32)

    preds = jax.block_until_ready(forward(params, inputs))
    ref = jax.block_until_ready(forward_ref(params, inputs))

    assert preds.shape == (T * B, output_dim), preds.shape
    np.testing.assert_allclose(np.asarray(preds), np.asarray(ref), rtol=1e-4, atol=1e-4)
    print("KERNEL_OK")
</pallas_src>

<mosaic_0001>
module attributes {stable_mosaic.version = 11 : i64} {
  func.func @_linear_kernel(%arg0: i32, %arg1: memref<16x16xf32, #tpu.memory_space<vmem>>, %arg2: memref<16x256xf32, #tpu.memory_space<vmem>>, %arg3: memref<1x256xf32, #tpu.memory_space<vmem>>, %arg4: memref<16x256xf32, #tpu.memory_space<vmem>>) attributes {dimension_semantics = [#tpu.dimension_semantics<parallel>], iteration_bounds = array<i64: 1>, scalar_prefetch = 0 : i64, scratch_operands = 0 : i64, tpu.core_type = #tpu.core_type<tc>, window_params = [{transform_indices = @transform_0, window_bounds = array<i64: 16, 16>}, {pipeline_mode = #tpu.pipeline_mode<synchronous>, transform_indices = @transform_1, window_bounds = array<i64: 16, 256>}, {pipeline_mode = #tpu.pipeline_mode<synchronous>, transform_indices = @transform_2, window_bounds = array<i64: 1, 256>}, {transform_indices = @transform_3, window_bounds = array<i64: 16, 256>}]} {
    %c0 = arith.constant 0 : index
    %c0_0 = arith.constant 0 : index
    %0 = vector.load %arg1[%c0, %c0_0] : memref<16x16xf32, #tpu.memory_space<vmem>>, vector<16x16xf32>
    %c0_1 = arith.constant 0 : index
    %c0_2 = arith.constant 0 : index
    %1 = vector.load %arg2[%c0_1, %c0_2] : memref<16x256xf32, #tpu.memory_space<vmem>>, vector<16x256xf32>
    %cst = arith.constant dense<0.000000e+00> : vector<16x256xf32>
    %2 = tpu.matmul %0, %1, %cst {dimension_numbers = #tpu.dot_dimension_numbers<[1], [0], [0], [1], [0, 0, 1, 1], [], []>} : vector<16x16xf32>, vector<16x256xf32>, vector<16x256xf32> -> vector<16x256xf32>
    %c0_3 = arith.constant 0 : index
    %c0_4 = arith.constant 0 : index
    %3 = vector.load %arg3[%c0_3, %c0_4] : memref<1x256xf32, #tpu.memory_space<vmem>>, vector<1x256xf32>
    %4 = vector.broadcast %3 : vector<1x256xf32> to vector<16x256xf32>
    %5 = arith.addf %2, %4 : vector<16x256xf32>
    %c0_5 = arith.constant 0 : index
    %c0_6 = arith.constant 0 : index
    %6 = vector.load %arg4[%c0_5, %c0_6] : memref<16x256xf32, #tpu.memory_space<vmem>>, vector<16x256xf32>
    tpu.vector_store %arg4[%c0_5, %c0_6], %5 {strides = array<i32>} : memref<16x256xf32, #tpu.memory_space<vmem>>, vector<16x256xf32>,
    return
  }
  func.func @transform_0(%arg0: i32) -> (i32, i32) {
    %c0_i32 = arith.constant 0 : i32
    %c0_i32_0 = arith.constant 0 : i32
    return %arg0, %c0_i32 : i32, i32
  }
  func.func @transform_1(%arg0: i32) -> (i32, i32) {
    %c0_i32 = arith.constant 0 : i32
    %c0_i32_0 = arith.constant 0 : i32
    %c0_i32_1 = arith.constant 0 : i32
    return %c0_i32, %c0_i32_0 : i32, i32
  }
  func.func @transform_2(%arg0: i32) -> (i32, i32) {
    %c0_i32 = arith.constant 0 : i32
    %c0_i32_0 = arith.constant 0 : i32
    %c0_i32_1 = arith.constant 0 : i32
    return %c0_i32, %c0_i32_0 : i32, i32
  }
  func.func @transform_3(%arg0: i32) -> (i32, i32) {
    %c0_i32 = arith.constant 0 : i32
    %c0_i32_0 = arith.constant 0 : i32
    return %arg0, %c0_i32 : i32, i32
  }
}

</mosaic_0001>

<bundles_post_ra>
// kernel: tpu_custom_call.1
= control target key start
LH: loop header
LB: loop body
LE: loop exit
PB: predicated region body
PF: predicated region fallthrough
CT: control target
= control target key end

     0   :  { %8 = vsyncpa [#allocation3], 0  ;;  %s328_s0 = inlined_call_operand.hbm [shape: f32[16,16], index: 0, kind: input, shape index: {}]   ;;  %s329_s1 = inlined_call_operand.hbm [shape: f32[16,256], index: 1, kind: input, shape index: {}]   ;;  %s330_s2 = inlined_call_operand.vmem [shape: f32[1,256], index: 2, kind: input, shape index: {}]   ;;  %s331_s3 = inlined_call_operand.hbm [shape: f32[16,256], index: 3, kind: output, shape index: {}]  }
   0x1   :  { %9 = vsyncpa [#allocation6], 0 }
   0x2   :  { %10 = vsyncpa [#allocation4], 0  ;;  %s255_s12 = smov [#allocation2]   ;;  %s183_s16 = scalar_lea.hbm %s328_s0, 256 }
   0x3   :  { %s16_s13 = sshll.u32 %s255_s12, 4  ;;  %p184_p0 = scmp.ne.s32.totalorder %s328_s0, %s183_s16  ;;  %s17_s13 = int_to_ptr.vmem [resolvable:$true] %s16_s13 }
   0x4   :  { %p187_p1 = scmp.lt.u32.totalorder %s183_s16, %s328_s0 }
   0x6   :  { %p189_p2 = pnand %p187_p1, %p184_p0 }
   0x8   :  { %192 = shalt.err (!%p189_p2)
}
   0x9   :  { %s193_s21 = scalar_lea.vmem %s17_s13, 256  ;;  %p198_p4 = scmp.lt.s32.totalorder %s17_s13, %s17_s13 }
   0xa   :  { %p194_p3 = scmp.ne.s32.totalorder %s17_s13, %s193_s21  ;;  %p199_p5 = scmp.lt.s32.totalorder %s193_s21, %s193_s21 }
   0xc   :  { %p200_p6 = por %p199_p5, %p198_p4 }
   0xe   :  { %p201_p7 = pnand %p200_p6, %p194_p3 }
  0x10   :  { %204 = shalt.err (!%p201_p7)
}
  0x11   :  { %s256_s22 = smov 128   ;;  %s257_s23 = smov 8  }
  0x12   :  { %22 = dma.hbm_to_vmem [thread:$0]  %s328_s0, 256, %s17_s13, [#allocation3], %s256_s22, %s256_s22, %s257_s23  }
  0x13   :  { %s258_s26 = smov [#allocation5]   ;;  %s205_s30 = scalar_lea.hbm %s329_s1, 512 }
  0x14   :  { %s28_s27 = sshll.u32 %s258_s26, 4  ;;  %p206_p8 = scmp.ne.s32.totalorder %s329_s1, %s205_s30  ;;  %s29_s27 = int_to_ptr.vmem [resolvable:$true] %s28_s27 }
  0x15   :  { %p209_p9 = scmp.lt.u32.totalorder %s205_s30, %s329_s1 }
  0x17   :  { %p211_p10 = pnand %p209_p9, %p206_p8 }
  0x19   :  { %214 = shalt.err (!%p211_p10)
}
  0x1a   :  { %s215_s8 = scalar_lea.vmem %s29_s27, 512  ;;  %p220_p12 = scmp.lt.s32.totalorder %s29_s27, %s29_s27 }
  0x1b   :  { %p216_p11 = scmp.ne.s32.totalorder %s29_s27, %s215_s8  ;;  %p221_p13 = scmp.lt.s32.totalorder %s215_s8, %s215_s8 }
  0x1d   :  { %p222_p0 = por %p221_p13, %p220_p12 }
  0x1f   :  { %p223_p1 = pnand %p222_p0, %p216_p11 }
  0x21   :  { %226 = shalt.err (!%p223_p1)
}
  0x22   :  { %s259_s0 = smov 256   ;;  %s260_s9 = smov 16  }
  0x23   :  { %34 = dma.hbm_to_vmem [thread:$0]  %s329_s1, 512, %s29_s27, [#allocation6], %s259_s0, %s259_s0, %s260_s9  }
  0x24   :  { %249 = dma.done.wait [#allocation3], 256  }
  0x25   :  { %250 = vsyncadd [#allocation3], 4294967040 }
  0x26   :  { %251 = dma.done.wait [#allocation6], 512  }
  0x27   :  { %252 = vsyncadd [#allocation6], 4294966784  ;;  %v261_v0 = vmov 0.0   ;;  %v46_v1 = vld [vmem:[#allocation5 + $0x8] sm:$0xff]  ;;  %v48_v2 = vld [vmem:[#allocation5 + $0x18] sm:$0xff]  ;;  %vm61_vm0 = vcmask 130048   ;;  %v51_v9 = vlaneseq }
  0x28   :  { %132 = vmatprep.mubr.f32.mxu0 %v261_v0  ;;  %138 = vmatprep.mubr.f32.mxu1 %v261_v0  ;;  %v45_v3 = vld [vmem:[#allocation5] sm:$0xff]  ;;  %v169_v4 = vpack.c.bf16 %v48_v2, %v46_v1  ;;  %v47_v5 = vld [vmem:[#allocation5 + $0x10] sm:$0xff]  ;;  %v44_v8 = vld [vmem:[#allocation2 + $0x8] sm:$0xff]  ;;  %s262_s13 = smov [#allocation7]  }
  0x29   :  { %v171_v6 = vpack.c.bf16 %v47_v5, %v45_v3  ;;  %v43_v7 = vld [vmem:[#allocation2] sm:$0xff]  ;;  %v52_v10 = vshrl.u32 %v51_v9, 7  ;;  %s154_s14 = sshll.u32 %s262_s13, 4  ;;  %s155_s14 = int_to_ptr.vmem [resolvable:$true] %s154_s14 }
  0x2a   :  { %170 = vmatprep.subr.bf16.mxu0 %v169_v4  ;;  %173 = vmatprep.subr.bf16.mxu1 %v169_v4  ;;  %v49_v12 = vld [vmem:[%s330_s2] sm:$0x3]  ;;  %s227_s15 = scalar_lea.vmem %s155_s14, 512  ;;  %p232_p3 = scmp.lt.s32.totalorder %s155_s14, %s155_s14 }
  0x2b   :  { %172 = vmatpush1.bf16.msra.mxu0 %v171_v6  ;;  %174 = vmatpush1.bf16.msra.mxu1 %v171_v6  ;;  %v53_v11 = vsub.s32 0, %v52_v10  ;;  %v57_v13 = vsub.s32 1, %v52_v10  ;;  %p228_p2 = scmp.ne.s32.totalorder %s155_s14, %s227_s15  ;;  %p233_p4 = scmp.lt.s32.totalorder %s227_s15, %s227_s15 }
  0x2d   :  { %v54_v14 = vrot.slane %v49_v12, %v53_v11  ;;  %v58_v15 = vrot.slane %v49_v12, %v57_v13  ;;  %p234_p5 = por %p233_p4, %p232_p3 }
  0x2e   :  { %167 = vmatmul.mubr.msk.f32.vlgmr.msra.gmra.mrb[0].mxu0 %vm61_vm0, %v43_v7  ;;  %168 = vmatmul.mubr.msk.f32.vlgmr.msra.gmra.mrb[0].mxu1 %vm61_vm0, %v44_v8 }
  0x2f   :  { %p235_p6 = pnand %p234_p5, %p228_p2 }
 0x101   :  { %v134_v16 = vpop.f32.mrb[0].mxu0  ;;  %v140_v17 = vpop.f32.mrb[0].mxu1 }
 0x102   :  { %v135_v18 = vadd.f32 %v134_v16, %v54_v14  ;;  %v141_v19 = vadd.f32 %v140_v17, %v54_v14  ;;  %v136_v20 = vpop.f32.mrb[1].mxu0  ;;  %v142_v21 = vpop.f32.mrb[1].mxu1 }
 0x103   :  { %v137_v22 = vadd.f32 %v136_v20, %v58_v15  ;;  %v143_v23 = vadd.f32 %v142_v21, %v58_v15 }
 0x104   :  { %145 = vst [vmem:[#allocation7] sm:$0xff] %v135_v18  ;;  %147 = vst [vmem:[#allocation7 + $0x10] sm:$0xff] %v141_v19 }
 0x105   :  { %146 = vst [vmem:[#allocation7 + $0x8] sm:$0xff] %v137_v22  ;;  %148 = vst [vmem:[#allocation7 + $0x18] sm:$0xff] %v143_v23 }
 0x106   :  { %238 = shalt.err (!%p235_p6)
}
 0x107   :  { %s239_s17 = scalar_lea.hbm %s331_s3, 512 }
 0x108   :  { %p240_p7 = scmp.ne.s32.totalorder %s331_s3, %s239_s17  ;;  %p243_p8 = scmp.lt.u32.totalorder %s239_s17, %s331_s3 }
 0x10a   :  { %p245_p9 = pnand %p243_p8, %p240_p7 }
 0x10c   :  { %248 = shalt.err (!%p245_p9)
}
 0x10d   :  { %160 = dma.vmem_to_hbm [thread:$0]  %s155_s14, 512, %s331_s3, [#allocation4], %s259_s0, %s259_s0, %s260_s9  }
 0x10e   :  { %253 = dma.done.wait [#allocation4], 512  }
 0x10f   :  { %254 = vsyncadd [#allocation4], 4294966784 }
 0x110   :  { %164 = vsyncpa [#allocation3], 1 }
 0x111   :  { %165 = vsyncpa [#allocation6], 1 }
 0x112   :  { %166 = vsyncpa [#allocation4], 1 }

</bundles_post_ra>
